<compile_context>
chip_gen: v7x
topology: tpu7x:2x2x1
jax: 0.10.0
libtpu: 0.0.40
codegen_flags: <defaults>
</compile_context>

<pallas_src>
import functools

import jax
import jax.numpy as jnp
from jax import lax
from jax.experimental import pallas as pl
from jax.experimental.pallas import tpu as pltpu


def _adv_align_kernel(s_ref, w_ref, b_ref, t_ref, out_ref, acc_ref, *,
                      hw, tp, steps, need_mask):
    """Fused 1x1-conv (lane-dense matmul + bias) -> squared-diff -> block accumulate."""
    i = pl.program_id(2)

    @pl.when(i == 0)
    def _():
        acc_ref[...] = jnp.zeros_like(acc_ref)

    s = s_ref[0]                              # (Cs, tp)  pixels on the lane axis
    w = w_ref[...]                            # (Ct, Cs)
    if s.dtype != w.dtype:                    # static: mixed dtypes -> promote to f32
        s = s.astype(jnp.float32)
        w = w.astype(jnp.float32)

    # MXU matmul in native dtype, f32 accumulation.
    aligned = jnp.dot(w, s, preferred_element_type=jnp.float32)       # (Ct, tp)
    aligned = aligned + b_ref[...].astype(jnp.float32)                # (Ct, 1) bias
    diff = aligned - t_ref[0].astype(jnp.float32)                     # (Ct, tp)
    sq = diff * diff

    if need_mask:  # static branch: only emitted when the pixel axis is ragged/over-tiled
        pb = pl.program_id(1) * steps + i     # logical (unclamped) pixel-block index
        pix = pb * tp + lax.broadcasted_iota(jnp.int32, sq.shape, 1)
        sq = jnp.where(pix < hw, sq, 0.0)

    acc_ref[...] += sq                        # pure VPU elementwise accumulate

    @pl.when(i == pl.num_programs(2) - 1)
    def _():
        # Single cross-lane reduce per (n, p) work unit; partial written to its own
        # lane-dense (8,128) slot.
        out_ref[...] = jnp.broadcast_to(jnp.sum(acc_ref[...]), out_ref.shape)


def _adv_noalign_kernel(s_ref, t_ref, out_ref, acc_ref, *,
                        hw, tp, steps, need_mask):
    """Squared-diff -> block accumulate (student/teacher channels already match)."""
    i = pl.program_id(2)

    @pl.when(i == 0)
    def _():
        acc_ref[...] = jnp.zeros_like(acc_ref)

    diff = s_ref[0].astype(jnp.float32) - t_ref[0].astype(jnp.float32)
    sq = diff * diff

    if need_mask:
        pb = pl.program_id(1) * steps + i
        pix = pb * tp + lax.broadcasted_iota(jnp.int32, sq.shape, 1)
        sq = jnp.where(pix < hw, sq, 0.0)

    acc_ref[...] += sq

    @pl.when(i == pl.num_programs(2) - 1)
    def _():
        out_ref[...] = jnp.broadcast_to(jnp.sum(acc_ref[...]), out_ref.shape)


def adv_loss(preds_S, preds_T, alpha_adv, weight=None, bias=None,
             target_block_bytes=2 << 20, num_partitions=2):
    """Pallas implementation of AdvLoss.forward.

    preds_S: (N, Cs, H, W), preds_T: (N, Ct, H, W) in NCHW (like the PyTorch module).
    weight:  (Ct, Cs, 1, 1) conv weight (required iff Cs != Ct), bias: (Ct,).
    """
    N, Cs, H, W = preds_S.shape
    Nt, Ct, Ht, Wt = preds_T.shape
    assert (H, W) == (Ht, Wt) and N == Nt
    hw = H * W

    # Free reshapes (NCHW is already contiguous as (N, C, H*W)); no transpose / cast.
    s3 = preds_S.reshape(N, Cs, hw)
    t3 = preds_T.reshape(N, Ct, hw)

    # Lane-dense pixel tile: multiple of 128, sized so one f32 block ~= target_block_bytes.
    # Double-buffered inputs + f32 accumulator stay ~10 MiB, safely inside every
    # generation's VMEM (incl. v7x's 64 MiB physical / 32 MiB scoped).
    c_max = max(Cs, Ct)
    tp = (target_block_bytes // (c_max * 4)) // 128 * 128
    if tp < 128 or tp >= hw:
        tp = hw                               # small spatial extent: whole H*W per block
    npb = -(-hw // tp)                        # number of pixel blocks
    # Only split the pixel axis across cores when the batch axis can't (N == 1);
    # this avoids duplicated tail blocks / extra partials in the common case.
    P = 1 if N > 1 else max(1, min(num_partitions, npb))
    steps = -(-npb // P)                      # sequential pixel blocks per (n, p) unit
    need_mask = (npb * tp != hw) or (P * steps != npb)

    def pix_idx(p, i):
        pb = p * steps + i
        if P * steps != npb:                  # static: clamp duplicated tail blocks
            pb = jnp.minimum(pb, npb - 1)
        return pb

    grid = (N, P, steps)
    out_shape = jax.ShapeDtypeStruct((N, P, 8, 128), jnp.float32)
    out_spec = pl.BlockSpec((1, 1, 8, 128), lambda n, p, i: (n, p, 0, 0))
    compiler_params = pltpu.CompilerParams(
        dimension_semantics=("parallel", "parallel", "arbitrary"),
        vmem_limit_bytes=32 * 1024 * 1024,
    )
    scratch = [pltpu.VMEM((Ct, tp), jnp.float32)]

    if weight is not None:
        w2d = jnp.asarray(weight).reshape(Ct, Cs)
        b2d = jnp.asarray(bias).reshape(Ct, 1)
        kernel = functools.partial(_adv_align_kernel, hw=hw, tp=tp,
                                   steps=steps, need_mask=need_mask)
        out = pl.pallas_call(
            kernel,
            out_shape=out_shape,
            grid_spec=pltpu.PrefetchScalarGridSpec(
                num_scalar_prefetch=0,
                grid=grid,
                in_specs=[
                    pl.BlockSpec((1, Cs, tp), lambda n, p, i: (n, 0, pix_idx(p, i))),
                    pl.BlockSpec((Ct, Cs), lambda n, p, i: (0, 0)),
                    pl.BlockSpec((Ct, 1), lambda n, p, i: (0, 0)),
                    pl.BlockSpec((1, Ct, tp), lambda n, p, i: (n, 0, pix_idx(p, i))),
                ],
                out_specs=out_spec,
                scratch_shapes=scratch,
            ),
            compiler_params=compiler_params,
        )(s3, w2d, b2d, t3)
    else:
        assert Cs == Ct, "align conv weight required when channel counts differ"
        kernel = functools.partial(_adv_noalign_kernel, hw=hw, tp=tp,
                                   steps=steps, need_mask=need_mask)
        out = pl.pallas_call(
            kernel,
            out_shape=out_shape,
            grid_spec=pltpu.PrefetchScalarGridSpec(
                num_scalar_prefetch=0,
                grid=grid,
                in_specs=[
                    pl.BlockSpec((1, Cs, tp), lambda n, p, i: (n, 0, pix_idx(p, i))),
                    pl.BlockSpec((1, Ct, tp), lambda n, p, i: (n, 0, pix_idx(p, i))),
                ],
                out_specs=out_spec,
                scratch_shapes=scratch,
            ),
            compiler_params=compiler_params,
        )(s3, t3)

    # Sum the per-(n, partition) partials in the wrapper, then apply / N * alpha_adv.
    partials = out[:, :, 0, 0]
    return jnp.sum(partials) * (jnp.float32(alpha_adv) / jnp.float32(N))


def _reference(preds_S, preds_T, alpha_adv, weight=None, bias=None):
    N = preds_T.shape[0]
    x = preds_S.astype(jnp.float32)
    if weight is not None:
        Ct, Cs = weight.shape[0], weight.shape[1]
        x = jnp.einsum('nchw,oc->nohw', x,
                       weight.reshape(Ct, Cs).astype(jnp.float32),
                       precision=lax.Precision.HIGHEST)
        x = x + bias.astype(jnp.float32)[None, :, None, None]
    return jnp.sum((x - preds_T.astype(jnp.float32)) ** 2) / N * alpha_adv


if __name__ == "__main__":
    key = jax.random.PRNGKey(0)
    k1, k2, k3, k4, k5, k6, k7 = jax.random.split(key, 7)

    alpha_adv = 1e-3

    # 1) Align path (student_channels=4 != teacher_channels=8 -> 1x1 conv).
    N, Cs, Ct, H, W = 2, 4, 8, 16, 16
    preds_S = jax.random.normal(k1, (N, Cs, H, W), jnp.float32)
    preds_T = jax.random.normal(k2, (N, Ct, H, W), jnp.float32)
    conv_w = jax.random.normal(k3, (Ct, Cs, 1, 1), jnp.float32) * 0.1
    conv_b = jax.random.normal(k4, (Ct,), jnp.float32) * 0.1

    loss = jax.block_until_ready(
        adv_loss(preds_S, preds_T, alpha_adv, weight=conv_w, bias=conv_b))
    ref = _reference(preds_S, preds_T, alpha_adv, weight=conv_w, bias=conv_b)
    assert jnp.allclose(loss, ref, rtol=1e-4, atol=1e-5), (loss, ref)

    # 2) No-align path (student_channels == teacher_channels).
    preds_S2 = jax.random.normal(k5, (N, Ct, H, W), jnp.float32)
    loss2 = jax.block_until_ready(adv_loss(preds_S2, preds_T, alpha_adv))
    ref2 = _reference(preds_S2, preds_T, alpha_adv)
    assert jnp.allclose(loss2, ref2, rtol=1e-4, atol=1e-5), (loss2, ref2)

    # 3) Ragged spatial size: small target_block_bytes forces 256-wide lane tiles
    #    (hw=576 -> 3 blocks), exercising the tail mask.
    H3 = W3 = 24
    preds_S3 = jax.random.normal(k6, (N, Cs, H3, W3), jnp.float32)
    preds_T3 = jax.random.normal(k7, (N, Ct, H3, W3), jnp.float32)
    loss3 = jax.block_until_ready(
        adv_loss(preds_S3, preds_T3, alpha_adv, weight=conv_w, bias=conv_b,
                 target_block_bytes=8 * 1024))
    ref3 = _reference(preds_S3, preds_T3, alpha_adv, weight=conv_w, bias=conv_b)
    assert jnp.allclose(loss3, ref3, rtol=1e-4, atol=1e-5), (loss3, ref3)

    # 4) N == 1 with ragged pixels: partitions the pixel axis (P=2) and exercises the
    #    clamped duplicate tail block + mask.
    loss4 = jax.block_until_ready(
        adv_loss(preds_S3[:1], preds_T3[:1], alpha_adv, weight=conv_w, bias=conv_b,
                 target_block_bytes=8 * 1024))
    ref4 = _reference(preds_S3[:1], preds_T3[:1], alpha_adv, weight=conv_w, bias=conv_b)
    assert jnp.allclose(loss4, ref4, rtol=1e-4, atol=1e-5), (loss4, ref4)

    # 5) bf16 inputs + bf16 conv params: matmul stays bf16 on the MXU (f32 accumulation).
    loss5 = jax.block_until_ready(
        adv_loss(preds_S.astype(jnp.bfloat16), preds_T.astype(jnp.bfloat16), alpha_adv,
                 weight=conv_w.astype(jnp.bfloat16), bias=conv_b.astype(jnp.bfloat16)))
    ref5 = _reference(preds_S.astype(jnp.bfloat16), preds_T.astype(jnp.bfloat16),
                      alpha_adv, weight=conv_w.astype(jnp.bfloat16),
                      bias=conv_b.astype(jnp.bfloat16))
    assert jnp.allclose(loss5, ref5, rtol=5e-3, atol=1e-4), (loss5, ref5)

    print("KERNEL_OK")
</pallas_src>

<mosaic_0001>
module attributes {stable_mosaic.version = 11 : i64} {
  func.func @_adv_align_kernel(%arg0: i32, %arg1: i32, %arg2: i32, %arg3: memref<1x4x256xf32, #tpu.memory_space<vmem>>, %arg4: memref<8x4xf32, #tpu.memory_space<vmem>>, %arg5: memref<8x1xf32, #tpu.memory_space<vmem>>, %arg6: memref<1x8x256xf32, #tpu.memory_space<vmem>>, %arg7: memref<1x1x8x128xf32, #tpu.memory_space<vmem>>, %arg8: memref<8x256xf32, #tpu.memory_space<vmem>>) attributes {dimension_semantics = [#tpu.dimension_semantics<parallel>, #tpu.dimension_semantics<parallel>, #tpu.dimension_semantics<arbitrary>], iteration_bounds = array<i64: 2, 1, 1>, scalar_prefetch = 0 : i64, scratch_operands = 1 : i64, tpu.core_type = #tpu.core_type<tc>, window_params = [{transform_indices = @transform_0, window_bounds = array<i64: 1, 4, 256>}, {pipeline_mode = #tpu.pipeline_mode<synchronous>, transform_indices = @transform_1, window_bounds = array<i64: 8, 4>}, {pipeline_mode = #tpu.pipeline_mode<synchronous>, transform_indices = @transform_2, window_bounds = array<i64: 8, 1>}, {transform_indices = @transform_3, window_bounds = array<i64: 1, 8, 256>}, {transform_indices = @transform_4, window_bounds = array<i64: 1, 1, 8, 128>}]} {
    %c0_i32 = arith.constant 0 : i32
    %0 = arith.cmpi eq, %arg2, %c0_i32 : i32
    %1 = arith.extui %0 : i1 to i32
    %c0_i32_0 = arith.constant 0 : i32
    %2 = arith.cmpi ne, %1, %c0_i32_0 : i32
    scf.if %2 {
      %cst_16 = arith.constant 0.000000e+00 : f32
      %20 = vector.broadcast %cst_16 : f32 to vector<8x256xf32>
      %c0_17 = arith.constant 0 : index
      %c0_18 = arith.constant 0 : index
      %21 = vector.load %arg8[%c0_17, %c0_18] : memref<8x256xf32, #tpu.memory_space<vmem>>, vector<8x256xf32>
      tpu.vector_store %arg8[%c0_17, %c0_18], %20 {strides = array<i32>} : memref<8x256xf32, #tpu.memory_space<vmem>>, vector<8x256xf32>,
    } else {
    }
    %c0 = arith.constant 0 : index
    %c0_1 = arith.constant 0 : index
    %c0_2 = arith.constant 0 : index
    %3 = vector.load %arg3[%c0, %c0_1, %c0_2] : memref<1x4x256xf32, #tpu.memory_space<vmem>>, vector<1x4x256xf32>
    %4 = vector.shape_cast %3 : vector<1x4x256xf32> to vector<4x256xf32>
    %c0_3 = arith.constant 0 : index
    %c0_4 = arith.constant 0 : index
    %5 = vector.load %arg4[%c0_3, %c0_4] : memref<8x4xf32, #tpu.memory_space<vmem>>, vector<8x4xf32>
    %cst = arith.constant dense<0.000000e+00> : vector<8x256xf32>
    %6 = tpu.matmul %5, %4, %cst {dimension_numbers = #tpu.dot_dimension_numbers<[1], [0], [0], [1], [0, 0, 1, 1], [], []>} : vector<8x4xf32>, vector<4x256xf32>, vector<8x256xf32> -> vector<8x256xf32>
    %c0_5 = arith.constant 0 : index
    %c0_6 = arith.constant 0 : index
    %7 = vector.load %arg5[%c0_5, %c0_6] : memref<8x1xf32, #tpu.memory_space<vmem>>, vector<8x1xf32>
    %8 = vector.broadcast %7 : vector<8x1xf32> to vector<8x256xf32>
    %9 = arith.addf %6, %8 : vector<8x256xf32>
    %c0_7 = arith.constant 0 : index
    %c0_8 = arith.constant 0 : index
    %c0_9 = arith.constant 0 : index
    %10 = vector.load %arg6[%c0_7, %c0_8, %c0_9] : memref<1x8x256xf32, #tpu.memory_space<vmem>>, vector<1x8x256xf32>
    %11 = vector.shape_cast %10 : vector<1x8x256xf32> to vector<8x256xf32>
    %12 = arith.subf %9, %11 : vector<8x256xf32>
    %13 = arith.mulf %12, %12 : vector<8x256xf32>
    %c0_10 = arith.constant 0 : index
    %c0_11 = arith.constant 0 : index
    %14 = vector.load %arg8[%c0_10, %c0_11] : memref<8x256xf32, #tpu.memory_space<vmem>>, vector<8x256xf32>
    %15 = arith.addf %14, %13 : vector<8x256xf32>
    %c0_12 = arith.constant 0 : index
    %c0_13 = arith.constant 0 : index
    %16 = vector.load %arg8[%c0_12, %c0_13] : memref<8x256xf32, #tpu.memory_space<vmem>>, vector<8x256xf32>
    tpu.vector_store %arg8[%c0_12, %c0_13], %15 {strides = array<i32>} : memref<8x256xf32, #tpu.memory_space<vmem>>, vector<8x256xf32>,
    %c0_i32_14 = arith.constant 0 : i32
    %17 = arith.cmpi eq, %arg2, %c0_i32_14 : i32
    %18 = arith.extui %17 : i1 to i32
    %c0_i32_15 = arith.constant 0 : i32
    %19 = arith.cmpi ne, %18, %c0_i32_15 : i32
    scf.if %19 {
      %c0_16 = arith.constant 0 : index
      %c0_17 = arith.constant 0 : index
      %20 = vector.load %arg8[%c0_16, %c0_17] : memref<8x256xf32, #tpu.memory_space<vmem>>, vector<8x256xf32>
      %21 = vector.shape_cast %20 : vector<8x256xf32> to vector<1x8x256xf32>
      %cst_18 = arith.constant dense<0.000000e+00> : vector<1xf32>
      %22 = vector.multi_reduction <add>, %21, %cst_18 [1, 2] : vector<1x8x256xf32> to vector<1xf32>
      %23 = vector.shape_cast %22 : vector<1xf32> to vector<1x1x1xf32>
      %24 = vector.extract %23[0, 0, 0] : f32 from vector<1x1x1xf32>
      %25 = vector.broadcast %24 : f32 to vector<1x1x8x128xf32>
      %c0_19 = arith.constant 0 : index
      %c0_20 = arith.constant 0 : index
      %c0_21 = arith.constant 0 : index
      %c0_22 = arith.constant 0 : index
      %26 = vector.load %arg7[%c0_19, %c0_20, %c0_21, %c0_22] : memref<1x1x8x128xf32, #tpu.memory_space<vmem>>, vector<1x1x8x128xf32>
      tpu.vector_store %arg7[%c0_19, %c0_20, %c0_21, %c0_22], %25 {strides = array<i32>} : memref<1x1x8x128xf32, #tpu.memory_space<vmem>>, vector<1x1x8x128xf32>,
    } else {
    }
    return
  }
  func.func @transform_0(%arg0: i32, %arg1: i32, %arg2: i32) -> (i32, i32, i32) {
    %c1_i32 = arith.constant 1 : i32
    %0 = arith.muli %arg1, %c1_i32 : i32
    %1 = arith.addi %0, %arg2 : i32
    %c0_i32 = arith.constant 0 : i32
    %c0_i32_0 = arith.constant 0 : i32
    return %arg0, %c0_i32, %1 : i32, i32, i32
  }
  func.func @transform_1(%arg0: i32, %arg1: i32, %arg2: i32) -> (i32, i32) {
    %c0_i32 = arith.constant 0 : i32
    %c0_i32_0 = arith.constant 0 : i32
    %c0_i32_1 = arith.constant 0 : i32
    return %c0_i32, %c0_i32_0 : i32, i32
  }
  func.func @transform_2(%arg0: i32, %arg1: i32, %arg2: i32) -> (i32, i32) {
    %c0_i32 = arith.constant 0 : i32
    %c0_i32_0 = arith.constant 0 : i32
    %c0_i32_1 = arith.constant 0 : i32
    return %c0_i32, %c0_i32_0 : i32, i32
  }
  func.func @transform_3(%arg0: i32, %arg1: i32, %arg2: i32) -> (i32, i32, i32) {
    %c1_i32 = arith.constant 1 : i32
    %0 = arith.muli %arg1, %c1_i32 : i32
    %1 = arith.addi %0, %arg2 : i32
    %c0_i32 = arith.constant 0 : i32
    %c0_i32_0 = arith.constant 0 : i32
    return %arg0, %c0_i32, %1 : i32, i32, i32
  }
  func.func @transform_4(%arg0: i32, %arg1: i32, %arg2: i32) -> (i32, i32, i32, i32) {
    %c0_i32 = arith.constant 0 : i32
    %c0_i32_0 = arith.constant 0 : i32
    %c0_i32_1 = arith.constant 0 : i32
    return %arg0, %arg1, %c0_i32, %c0_i32_0 : i32, i32, i32, i32
  }
}

</mosaic_0001>

<bundles_post_ra>
// kernel: tpu_custom_call.1
= control target key start
LH: loop header
LB: loop body
LE: loop exit
PB: predicated region body
PF: predicated region fallthrough
CT: control target
= control target key end

     0   :  { %9 = vsyncpa [#allocation4], 0  ;;  %s950_s0 = inlined_call_operand.hbm [shape: f32[2,4,256], index: 0, kind: input, shape index: {}]   ;;  %s951_s1 = inlined_call_operand.vmem [shape: f32[8,4], index: 1, kind: input, shape index: {}]   ;;  %s952_s2 = inlined_call_operand.vmem [shape: f32[8,1], index: 2, kind: input, shape index: {}]   ;;  %s953_s3 = inlined_call_operand.vmem [shape: f32[2,8,256], index: 3, kind: input, shape index: {}]   ;;  %s954_s4 = inlined_call_operand.hbm [shape: f32[2,1,8,128], index: 4, kind: output, shape index: {}]  }
   0x1   :  { %11 = vsyncpa [#allocation4 + $0x1], 0 }
   0x2   :  { %12 = vsyncpa [#allocation5], 0 }
   0x3   :  { %14 = vsyncpa [#allocation5 + $0x1], 0  ;;  %s763_s15 = smov 0   ;;  %s765_s16 = smov 0  }
   0x4   :  { %s767_s17 = smov 0   ;;  %s769_s18 = smov 0  }
   0x5   :  { %s771_s19 = smov 0   ;;  %s773_s20 = smov 0  }
   0x6 LB: > { %s531_s21 = sadd.s32 4294967295, %s732_s20   ;;  %s532_s22 = sadd.s32 4294967294, %s732_s20   ;;  %s732_s20 = sphi %s773_s20, %s20_s20   ;;  %s728_s19 = sphi %s771_s19, %s970_s19   ;;  %s724_s18 = sphi %s769_s18, %s969_s18   ;;  %s720_s17 = sphi %s767_s17, %s968_s17   ;;  %s716_s16 = sphi %s765_s16, %s967_s16   ;;  %s712_s15 = sphi %s763_s15, %s966_s15  }
   0x7   : > { %s39_s23 = sadd.s32 1, %s728_s19  ;;  %s50_s24 = sadd.s32 1, %s720_s17 }
   0x8   : > { %p41_p0 = scmp.ge.s32.totalorder %s39_s23, 2  ;;  %p57_p1 = scmp.ne.s32.totalorder %s720_s17, %s716_s16 }
   0x9   : > { %p58_p2 = scmp.eq.s32.totalorder %s732_s20, 0  ;;  %p63_p3 = scmp.ne.s32.totalorder %s716_s16, %s712_s15 }
   0xa   : > { %s972_s23 = smov (%p41_p0, %s39_s23), 0  ;;  %p64_p5 = scmp.eq.s32.totalorder %s531_s21, 0 }
   0xb   : > { %p804_p4 = por %p58_p2, %p57_p1  ;;  %s45_s26 = ssub.s32 %s728_s19, %s972_s23 }
   0xc   : > { %p161_p6 = scmp.eq.s32.totalorder %s531_s21, 1  ;;  %p48_p7 = scmp.eq.s32.totalorder %s45_s26, 0 }
   0xd   : > { %p810_p8 = por %p64_p5, %p63_p3  ;;  %p167_p10 = scmp.eq.s32.totalorder %s532_s22, 1 }
   0xe   : > { %p814_p9 = por %p161_p6, %p57_p1  ;;  %p566_p13 = scmp.lt.s32.totalorder %s732_s20, 2 }
   0xf   : > { %s819_s29 = scalar_select %p48_p7, %s720_s17, %s50_s24  }
  0x10   : > { %s958_s28 = scalar_select %p814_p9, 1, 0 }
  0x11   : > { %p821_p11 = por %p167_p10, %p63_p3  ;;  %s193_s5 = sand.u32 1, %s720_s17  }
  0x12   : > { %s535_s6 = sshll.u32 %s193_s5, 3  ;;  %s550_s7 = sshll.u32 %s728_s19, 7 }
  0x13   : > { %s959_s30 = scalar_select %p821_p11, 1, 0 }
  0x14   : > { %s832_s10 = scalar_lea.hbm %s950_s0, %s550_s7  ;;  %s197_s11 = scalar_lea.vmem [#allocation3], %s535_s6 }
  0x15   : > { %s208_s12 = sshll.u32 %s197_s11, 4  ;;  %p838_p0 = pnand %p566_p13, %p804_p4  ;;  %s834_s12 = int_to_ptr.vmem [resolvable:$true] %s208_s12 }
  0x16   : > { %s194_s14 = scalar_lea.sflag [#allocation4], %s193_s5  ;;  %s620_s21 = scalar_lea.hbm %s832_s10, 128 }
  0x17   : > { %p621_p3 = scmp.ne.s32.totalorder %s832_s10, %s620_s21  ;;  %p622_p5 = pneg %p838_p0 }
  0x18   : > { %s625_s25 = scalar_lea.hbm %s950_s0, 256  ;;  %p626_p4 = scmp.lt.u32.totalorder %s832_s10, %s950_s0 }
  0x19   : > { %p623_p6 = pnand %p622_p5, %p621_p3  ;;  %p627_p10 = scmp.lt.u32.totalorder %s625_s25, %s620_s21 }
  0x1a   : > { %p629_p12 = scmp.lt.u32.totalorder %s620_s21, %s832_s10 }
  0x1b   : > { %p624_p7 = pneg %p623_p6  ;;  %p628_p13 = por %p627_p10, %p626_p4 }
  0x1d   : > { %p630_p1 = por %p629_p12, %p628_p13 }
  0x1f   : > { %p631_p2 = pnand %p630_p1, %p624_p7 }
  0x21   : > { %634 = shalt.err (!%p631_p2)
}
  0x22   : > { %s635_s5 = scalar_lea.vmem %s834_s12, 128  ;;  %s734_s7 = smov [#allocation3]  }
  0x23   : > { %p636_p3 = scmp.ne.s32.totalorder %s834_s12, %s635_s5  ;;  %s640_s8 = sshll.u32 %s734_s7, 4  ;;  %s641_s8 = int_to_ptr.vmem [resolvable:$false] %s640_s8 }
  0x24   : > { %s642_s9 = scalar_lea.vmem %s641_s8, 256  ;;  %p643_p9 = scmp.lt.s32.totalorder %s834_s12, %s641_s8 }
  0x25   : > { %p638_p6 = pnand %p636_p3, %p622_p5  ;;  %p644_p4 = scmp.lt.s32.totalorder %s642_s9, %s635_s5 }
  0x27   : > { %p639_p11 = pneg %p638_p6  ;;  %p645_p10 = por %p644_p4, %p643_p9 }
  0x29   : > { %p646_p12 = pnand %p645_p10, %p639_p11 }
  0x2b   : > { %649 = shalt.err (!%p646_p12)
}
  0x2c   : > { %561 = dma.hbm_to_vmem [thread:$0]  (!%p838_p0), %s832_s10, 128, %s834_s12, %s194_s14  }
  0x2d   : > { %p961_p1 = scmp.lt.s32.totalorder %s732_s20, 3  ;;  %p962_p2 = scmp.ge.s32.totalorder %s732_s20, 1 }
  0x2f   : > { %p229_p5 = pnand %p962_p2, %p961_p1 }
  0x30   : > { %s874_s11 = sand.u32 (!%p229_p5), 1, %s716_s16  }
  0x31   : > { %232 = sbr.rel (%p229_p5) target bundleno = 502 (0x1f6), region = 36  ;;  %s539_s21 = sshll.u32 (!%p229_p5), %s874_s11, 3 }
  0x32   : > { %s235_s22 = scalar_lea.sflag (!%p229_p5), [#allocation4], %s874_s11  ;;  %s238_s13 = scalar_lea.vmem (!%p229_p5), [#allocation3], %s539_s21 }
  0x38   : > { %703 = dma.done.wait (%p810_p8), %s235_s22, 128  }
  0x39   : > { %705 = vsyncadd (%p810_p8), %s235_s22, 4294967168  ;;  %v735_v0 = vmov 0.0   ;;  %v736_v1 = vmov 0   ;;  %v293_v2 = vld [vmem:[%s238_s13] sm:$0xff]  ;;  %vm307_vm0 = vcmask 1043456   ;;  %vm303_vm1 = vcmask 31744  }
  0x3a   : > { %376 = vmatprep.mubr.f32.mxu0 %v735_v0  ;;  %618 = vset.pattern.permute.xlu0 %v736_v1  ;;  %v295_v3 = vld [vmem:[%s952_s2] sm:$0xff]  ;;  %v302_v4 = vcombine.high %v293_v2, %v293_v2  ;;  %p277_p8 = scmp.lt.s32.totalorder %s724_s18, 1  ;;  %s272_s7 = scalar_lea.vmem [#allocation6], %s539_s21 }
  0x3b   : > { %298 = vperm.xlu0 %618, %v295_v3   ;;  %v294_v5 = vld [vmem:[%s951_s1] sm:$0xff]  ;;  %s427_s8 = sshll.u32 %s272_s7, 4  ;;  %s547_s9 = sshll.u32 %s724_s18, 7  ;;  %s898_s8 = int_to_ptr.vmem [resolvable:$true] %s427_s8 }
  0x3c   : > { %543 = vmatprep.subr.msk.mxu0 %vm307_vm0, %v302_v4  ;;  %s278_s27 = scalar_select %p277_p8, %s724_s18, 1 }
  0x3d   : > { %544 = vmatpush1.msk.msra.mxu0 %vm307_vm0, %v293_v2  ;;  %s903_s12 = scalar_lea.hbm %s954_s4, %s547_s9  ;;  %s413_s14 = scalar_lea.sflag [#allocation5], %s874_s11 }
  0x3e   : > { %545 = vmatmul.mubr.msk.f32.vlgmr.msra.gmra.mrb[0].mxu0 %vm303_vm1, %v294_v5  ;;  %s551_s25 = sshll.u32 %s278_s27, 4  ;;  %s650_s24 = scalar_lea.vmem %s898_s8, 128 }
  0x3f   : > { %s284_s5 = scalar_lea.vmem %s953_s3, %s551_s25  ;;  %p651_p9 = scmp.ne.s32.totalorder %s898_s8, %s650_s24 }
  0x40   : > { %v383_v8 = vld [vmem:[%s284_s5] sm:$0xff]  ;;  %v384_v11 = vld [vmem:[%s284_s5 + $0x8] sm:$0xff]  ;;  %p963_p11 = scmp.ne.s32.totalorder %s958_s28, 0  ;;  %s737_s18 = smov [#allocation6]  }
  0x41   : > { %s654_s21 = sshll.u32 %s737_s18, 4  ;;  %s655_s21 = int_to_ptr.vmem [resolvable:$false] %s654_s21 }
  0x42   : > { %p652_p0 = pnand %p651_p9, %p963_p11  ;;  %s656_s27 = scalar_lea.vmem %s655_s21, 256 }
  0x43   : > { %p657_p13 = scmp.lt.s32.totalorder %s898_s8, %s655_s21  ;;  %p658_p3 = scmp.lt.s32.totalorder %s656_s27, %s650_s24 }
  0x44   : > { %p653_p7 = pneg %p652_p0 }
  0x45   : > { %p659_p6 = por %p658_p3, %p657_p13 }
  0x47   : > { %p660_p4 = pnand %p659_p6, %p653_p7 }
  0xba   : > { %v299_v6 = vpop.permute.xlu0 %298 }
 0x111   : > { %v378_v7 = vpop.f32.mrb[0].mxu0 }
 0x112   : > { %v379_v9 = vadd.f32 %v378_v7, %v299_v6  ;;  %v380_v10 = vpop.f32.mrb[1].mxu0 }
 0x113   : > { %v381_v12 = vadd.f32 %v380_v10, %v299_v6 }
 0x114   : > { %v385_v13 = vsub.f32 %v379_v9, %v383_v8 }
 0x115   : > { %v386_v14 = vsub.f32 %v381_v12, %v384_v11 }
 0x116   : > { %v387_v15 = vmul.f32 %v385_v13, %v385_v13 }
 0x117   : > { %v388_v16 = vmul.f32 %v386_v14, %v386_v14 }
 0x119   : > { %v400_v17 = vadd.f32 %v388_v16, %v387_v15 }
 0x11b   : > { %401 = vadd.xlane.f32.xlu0 %v400_v17 }
 0x1a8   : > { %v402_v18 = vpop.xlane.xlu0 %401 }
 0x1a9   : > { %v403_v19 = vrot.slane %v402_v18, 4 }
 0x1ab   : > { %v404_v20 = vadd.f32 %v403_v19, %v402_v18 }
 0x1ad   : > { %v405_v21 = vrot.slane %v404_v20, 2 }
 0x1af   : > { %v406_v22 = vadd.f32 %v405_v21, %v404_v20 }
 0x1b1   : > { %v407_v23 = vrot.slane %v406_v22, 1 }
 0x1b3   : > { %v408_v24 = vadd.f32 %v407_v23, %v406_v22 }
 0x1b5   : > { %552 = vpush %v408_v24 }
 0x1e6   : > { %s553_s22 = spop %552 }
 0x1e7   : > { %v410_v25 = vstv %s553_s22 }
 0x1e8   : > { %411 = vst [vmem:[%s272_s7] sm:$0xff] %v410_v25 }
 0x1e9   : > { %663 = shalt.err (!%p660_p4)
}
 0x1ea   : > { %s664_s11 = scalar_lea.hbm %s903_s12, 128  ;;  %s668_s6 = scalar_lea.hbm %s954_s4, 256 }
 0x1eb   : > { %p665_p10 = scmp.ne.s32.totalorder %s903_s12, %s664_s11  ;;  %p669_p2 = scmp.lt.u32.totalorder %s903_s12, %s954_s4 }
 0x1ec   : > { %p670_p5 = scmp.lt.u32.totalorder %s668_s6, %s664_s11  ;;  %p672_p9 = scmp.lt.u32.totalorder %s664_s11, %s903_s12 }
 0x1ed   : > { %p666_p12 = pnand %p665_p10, %p963_p11 }
 0x1ee   : > { %p671_p8 = por %p670_p5, %p669_p2 }
 0x1ef   : > { %p667_p1 = pneg %p666_p12 }
 0x1f0   : > { %p673_p0 = por %p672_p9, %p671_p8 }
 0x1f2   : > { %p674_p7 = pnand %p673_p0, %p667_p1 }
 0x1f4   : > { %677 = shalt.err (!%p674_p7)
}
 0x1f5   : > { %556 = dma.vmem_to_hbm [thread:$0]  (%p963_p11), %s898_s8, 128, %s903_s12, %s413_s14  }
 0x1f6 PF: > { %s439_s9 = sand.u32 1, %s712_s15   ;;  %p964_p13 = scmp.ne.s32.totalorder %s959_s30, 0 }
 0x1f7   : > { %p965_p3 = scmp.ge.s32.totalorder %s732_s20, 2  ;;  %s440_s22 = scalar_lea.sflag [#allocation5], %s439_s9 }
 0x1f9   : > { %p563_p6 = pnand %p965_p3, %p964_p13 }
 0x1fb   : > { %707 = dma.done.wait (!%p563_p6), %s440_s22, 128  }
 0x1fc   : > { %709 = vsyncadd (!%p563_p6), %s440_s22, 4294967168  ;;  %s20_s20 = sadd.s32 1, %s732_s20   ;;  %s966_s15 = smov %s716_s16 }
 0x1fd   : > { %p17_p4 = scmp.ge.s32.totalorder %s20_s20, 4   ;;  %s967_s16 = smov %s720_s17 }
 0x1fe   : > { %s968_s17 = smov %s819_s29  ;;  %s969_s18 = smov %s728_s19 }
 0x1ff   : > { %s970_s19 = smov %s972_s23  ;;  %19 = sbr.rel (!%p17_p4) target bundleno = 6 (0x6), region = 92 }
 0x206   :  { %445 = vsyncpa [#allocation4], 1 }
 0x207   :  { %447 = vsyncpa [#allocation4 + $0x1], 1 }
 0x208   :  { %448 = vsyncpa [#allocation5], 1 }
 0x209   :  { %450 = vsyncpa [#allocation5 + $0x1], 1 }

</bundles_post_ra>
